<compile_context>
chip_gen: v6e
topology: v6e:2x2x1
jax: 0.10.0
libtpu: 0.0.40
codegen_flags: <defaults>
</compile_context>

<pallas_src>
import jax
import jax.numpy as jnp
from jax.experimental import pallas as pl
from jax.experimental.pallas import tpu as pltpu

NUM_LAYERS = 10
FEAT = 2
LANE = 128


def logic_circuit_kernel(w_ref, b_ref, x_ref, o_ref):
    # w_ref: SMEM f32[40]  (layer-major, [out, in] within a layer)
    # b_ref: SMEM f32[20]
    # x_ref: VMEM (2, TB)  feature on sublane axis, batch on lane axis
    # o_ref: VMEM (2, TB)
    h0 = x_ref[0:1, :]          # (1, TB)
    h1 = x_ref[1:2, :]          # (1, TB)
    for l in range(NUM_LAYERS):                 # statically unrolled
        w00 = w_ref[4 * l + 0]
        w01 = w_ref[4 * l + 1]
        w10 = w_ref[4 * l + 2]
        w11 = w_ref[4 * l + 3]
        b0 = b_ref[2 * l + 0]
        b1 = b_ref[2 * l + 1]
        n0 = h0 * w00 + h1 * w01 + b0           # scalar-broadcast VPU ops
        n1 = h0 * w10 + h1 * w11 + b1
        if l < NUM_LAYERS - 1:                  # ReLU after fc1..fc9 only
            n0 = jnp.maximum(n0, 0.0)
            n1 = jnp.maximum(n1, 0.0)
        h0, h1 = n0, n1
    o_ref[0:1, :] = h0
    o_ref[1:2, :] = h1


def logic_circuit(x, w, b, *, block_batch=2048):
    """x: (B, 2) f32, w: (10, 2, 2) [out, in] per layer, b: (10, 2)."""
    B = x.shape[0]

    # Lane-dense activation layout: (FEAT, B) with batch on the lane axis,
    # padded so the lane dimension is a multiple of the 128-lane tile.
    tb = min(block_batch, pl.cdiv(B, LANE) * LANE)
    b_pad = pl.cdiv(B, tb) * tb
    xt = x.T                                    # (2, B)
    if b_pad != B:
        xt = jnp.pad(xt, ((0, 0), (0, b_pad - B)))

    w_flat = w.reshape(-1)                      # (40,) -> SMEM scalars
    b_flat = b.reshape(-1)                      # (20,) -> SMEM scalars

    out_t = pl.pallas_call(
        logic_circuit_kernel,
        out_shape=jax.ShapeDtypeStruct((FEAT, b_pad), x.dtype),
        grid=(b_pad // tb,),
        in_specs=[
            pl.BlockSpec(memory_space=pltpu.MemorySpace.SMEM),   # w_flat
            pl.BlockSpec(memory_space=pltpu.MemorySpace.SMEM),   # b_flat
            pl.BlockSpec((FEAT, tb), lambda i: (0, i)),          # x tile
        ],
        out_specs=pl.BlockSpec((FEAT, tb), lambda i: (0, i)),
        compiler_params=pltpu.CompilerParams(
            dimension_semantics=("parallel",)),
    )(w_flat, b_flat, xt)

    return out_t[:, :B].T                       # back to (B, 2)


def init_params(key):
    # Deterministic synthetic init mimicking nn.Linear's U(-1/sqrt(in), 1/sqrt(in)).
    kw, kb = jax.random.split(key)
    bound = 1.0 / jnp.sqrt(jnp.float32(FEAT))
    w = jax.random.uniform(kw, (NUM_LAYERS, FEAT, FEAT), jnp.float32, -bound, bound)
    b = jax.random.uniform(kb, (NUM_LAYERS, FEAT), jnp.float32, -bound, bound)
    return w, b


def reference(x, w, b):
    h = x
    for l in range(NUM_LAYERS):
        h = h @ w[l].T + b[l]
        if l < NUM_LAYERS - 1:
            h = jnp.maximum(h, 0.0)
    return h


if __name__ == "__main__":
    key = jax.random.PRNGKey(0)
    kx, kp = jax.random.split(key)

    B = 8  # small batch of 2-feature inputs, matching the AND-circuit module
    x = jax.random.uniform(kx, (B, FEAT), jnp.float32)
    w, b = init_params(kp)

    out = logic_circuit(x, w, b)
    out = jax.block_until_ready(out)

    ref = reference(x, w, b)
    assert out.shape == (B, FEAT)
    assert jnp.allclose(out, ref, atol=1e-5, rtol=1e-5)

    print("KERNEL_OK")
</pallas_src>

<mosaic_0001>
module attributes {stable_mosaic.version = 11 : i64} {
  func.func @logic_circuit_kernel(%arg0: i32, %arg1: memref<40xf32, #tpu.memory_space<smem>>, %arg2: memref<20xf32, #tpu.memory_space<smem>>, %arg3: memref<2x128xf32, #tpu.memory_space<vmem>>, %arg4: memref<2x128xf32, #tpu.memory_space<vmem>>) attributes {dimension_semantics = [#tpu.dimension_semantics<parallel>], iteration_bounds = array<i64: 1>, scalar_prefetch = 0 : i64, scratch_operands = 0 : i64, tpu.core_type = #tpu.core_type<tc>, window_params = [{transform_indices = @transform_0, window_bounds = array<i64: 40>}, {transform_indices = @transform_1, window_bounds = array<i64: 20>}, {transform_indices = @transform_2, window_bounds = array<i64: 2, 128>}, {transform_indices = @transform_3, window_bounds = array<i64: 2, 128>}]} {
    %c0 = arith.constant 0 : index
    %c0_0 = arith.constant 0 : index
    %0 = vector.load %arg3[%c0, %c0_0] : memref<2x128xf32, #tpu.memory_space<vmem>>, vector<1x128xf32>
    %c1 = arith.constant 1 : index
    %c0_1 = arith.constant 0 : index
    %1 = vector.load %arg3[%c1, %c0_1] : memref<2x128xf32, #tpu.memory_space<vmem>>, vector<1x128xf32>
    %c0_2 = arith.constant 0 : index
    %2 = memref.load %arg1[%c0_2] : memref<40xf32, #tpu.memory_space<smem>>
    %c1_3 = arith.constant 1 : index
    %3 = memref.load %arg1[%c1_3] : memref<40xf32, #tpu.memory_space<smem>>
    %c2 = arith.constant 2 : index
    %4 = memref.load %arg1[%c2] : memref<40xf32, #tpu.memory_space<smem>>
    %c3 = arith.constant 3 : index
    %5 = memref.load %arg1[%c3] : memref<40xf32, #tpu.memory_space<smem>>
    %c0_4 = arith.constant 0 : index
    %6 = memref.load %arg2[%c0_4] : memref<20xf32, #tpu.memory_space<smem>>
    %c1_5 = arith.constant 1 : index
    %7 = memref.load %arg2[%c1_5] : memref<20xf32, #tpu.memory_space<smem>>
    %8 = vector.broadcast %2 : f32 to vector<1x128xf32>
    %9 = arith.mulf %0, %8 : vector<1x128xf32>
    %10 = vector.broadcast %3 : f32 to vector<1x128xf32>
    %11 = arith.mulf %1, %10 : vector<1x128xf32>
    %12 = arith.addf %9, %11 : vector<1x128xf32>
    %13 = vector.broadcast %6 : f32 to vector<1x128xf32>
    %14 = arith.addf %12, %13 : vector<1x128xf32>
    %15 = vector.broadcast %4 : f32 to vector<1x128xf32>
    %16 = arith.mulf %0, %15 : vector<1x128xf32>
    %17 = vector.broadcast %5 : f32 to vector<1x128xf32>
    %18 = arith.mulf %1, %17 : vector<1x128xf32>
    %19 = arith.addf %16, %18 : vector<1x128xf32>
    %20 = vector.broadcast %7 : f32 to vector<1x128xf32>
    %21 = arith.addf %19, %20 : vector<1x128xf32>
    %cst = arith.constant 0.000000e+00 : f32
    %22 = vector.broadcast %cst : f32 to vector<1x128xf32>
    %23 = arith.maximumf %14, %22 : vector<1x128xf32>
    %cst_6 = arith.constant 0.000000e+00 : f32
    %24 = vector.broadcast %cst_6 : f32 to vector<1x128xf32>
    %25 = arith.maximumf %21, %24 : vector<1x128xf32>
    %c4 = arith.constant 4 : index
    %26 = memref.load %arg1[%c4] : memref<40xf32, #tpu.memory_space<smem>>
    %c5 = arith.constant 5 : index
    %27 = memref.load %arg1[%c5] : memref<40xf32, #tpu.memory_space<smem>>
    %c6 = arith.constant 6 : index
    %28 = memref.load %arg1[%c6] : memref<40xf32, #tpu.memory_space<smem>>
    %c7 = arith.constant 7 : index
    %29 = memref.load %arg1[%c7] : memref<40xf32, #tpu.memory_space<smem>>
    %c2_7 = arith.constant 2 : index
    %30 = memref.load %arg2[%c2_7] : memref<20xf32, #tpu.memory_space<smem>>
    %c3_8 = arith.constant 3 : index
    %31 = memref.load %arg2[%c3_8] : memref<20xf32, #tpu.memory_space<smem>>
    %32 = vector.broadcast %26 : f32 to vector<1x128xf32>
    %33 = arith.mulf %23, %32 : vector<1x128xf32>
    %34 = vector.broadcast %27 : f32 to vector<1x128xf32>
    %35 = arith.mulf %25, %34 : vector<1x128xf32>
    %36 = arith.addf %33, %35 : vector<1x128xf32>
    %37 = vector.broadcast %30 : f32 to vector<1x128xf32>
    %38 = arith.addf %36, %37 : vector<1x128xf32>
    %39 = vector.broadcast %28 : f32 to vector<1x128xf32>
    %40 = arith.mulf %23, %39 : vector<1x128xf32>
    %41 = vector.broadcast %29 : f32 to vector<1x128xf32>
    %42 = arith.mulf %25, %41 : vector<1x128xf32>
    %43 = arith.addf %40, %42 : vector<1x128xf32>
    %44 = vector.broadcast %31 : f32 to vector<1x128xf32>
    %45 = arith.addf %43, %44 : vector<1x128xf32>
    %cst_9 = arith.constant 0.000000e+00 : f32
    %46 = vector.broadcast %cst_9 : f32 to vector<1x128xf32>
    %47 = arith.maximumf %38, %46 : vector<1x128xf32>
    %cst_10 = arith.constant 0.000000e+00 : f32
    %48 = vector.broadcast %cst_10 : f32 to vector<1x128xf32>
    %49 = arith.maximumf %45, %48 : vector<1x128xf32>
    %c8 = arith.constant 8 : index
    %50 = memref.load %arg1[%c8] : memref<40xf32, #tpu.memory_space<smem>>
    %c9 = arith.constant 9 : index
    %51 = memref.load %arg1[%c9] : memref<40xf32, #tpu.memory_space<smem>>
    %c10 = arith.constant 10 : index
    %52 = memref.load %arg1[%c10] : memref<40xf32, #tpu.memory_space<smem>>
    %c11 = arith.constant 11 : index
    %53 = memref.load %arg1[%c11] : memref<40xf32, #tpu.memory_space<smem>>
    %c4_11 = arith.constant 4 : index
    %54 = memref.load %arg2[%c4_11] : memref<20xf32, #tpu.memory_space<smem>>
    %c5_12 = arith.constant 5 : index
    %55 = memref.load %arg2[%c5_12] : memref<20xf32, #tpu.memory_space<smem>>
    %56 = vector.broadcast %50 : f32 to vector<1x128xf32>
    %57 = arith.mulf %47, %56 : vector<1x128xf32>
    %58 = vector.broadcast %51 : f32 to vector<1x128xf32>
    %59 = arith.mulf %49, %58 : vector<1x128xf32>
    %60 = arith.addf %57, %59 : vector<1x128xf32>
    %61 = vector.broadcast %54 : f32 to vector<1x128xf32>
    %62 = arith.addf %60, %61 : vector<1x128xf32>
    %63 = vector.broadcast %52 : f32 to vector<1x128xf32>
    %64 = arith.mulf %47, %63 : vector<1x128xf32>
    %65 = vector.broadcast %53 : f32 to vector<1x128xf32>
    %66 = arith.mulf %49, %65 : vector<1x128xf32>
    %67 = arith.addf %64, %66 : vector<1x128xf32>
    %68 = vector.broadcast %55 : f32 to vector<1x128xf32>
    %69 = arith.addf %67, %68 : vector<1x128xf32>
    %cst_13 = arith.constant 0.000000e+00 : f32
    %70 = vector.broadcast %cst_13 : f32 to vector<1x128xf32>
    %71 = arith.maximumf %62, %70 : vector<1x128xf32>
    %cst_14 = arith.constant 0.000000e+00 : f32
    %72 = vector.broadcast %cst_14 : f32 to vector<1x128xf32>
    %73 = arith.maximumf %69, %72 : vector<1x128xf32>
    %c12 = arith.constant 12 : index
    %74 = memref.load %arg1[%c12] : memref<40xf32, #tpu.memory_space<smem>>
    %c13 = arith.constant 13 : index
    %75 = memref.load %arg1[%c13] : memref<40xf32, #tpu.memory_space<smem>>
    %c14 = arith.constant 14 : index
    %76 = memref.load %arg1[%c14] : memref<40xf32, #tpu.memory_space<smem>>
    %c15 = arith.constant 15 : index
    %77 = memref.load %arg1[%c15] : memref<40xf32, #tpu.memory_space<smem>>
    %c6_15 = arith.constant 6 : index
    %78 = memref.load %arg2[%c6_15] : memref<20xf32, #tpu.memory_space<smem>>
    %c7_16 = arith.constant 7 : index
    %79 = memref.load %arg2[%c7_16] : memref<20xf32, #tpu.memory_space<smem>>
    %80 = vector.broadcast %74 : f32 to vector<1x128xf32>
    %81 = arith.mulf %71, %80 : vector<1x128xf32>
    %82 = vector.broadcast %75 : f32 to vector<1x128xf32>
    %83 = arith.mulf %73, %82 : vector<1x128xf32>
    %84 = arith.addf %81, %83 : vector<1x128xf32>
    %85 = vector.broadcast %78 : f32 to vector<1x128xf32>
    %86 = arith.addf %84, %85 : vector<1x128xf32>
    %87 = vector.broadcast %76 : f32 to vector<1x128xf32>
    %88 = arith.mulf %71, %87 : vector<1x128xf32>
    %89 = vector.broadcast %77 : f32 to vector<1x128xf32>
    %90 = arith.mulf %73, %89 : vector<1x128xf32>
    %91 = arith.addf %88, %90 : vector<1x128xf32>
    %92 = vector.broadcast %79 : f32 to vector<1x128xf32>
    %93 = arith.addf %91, %92 : vector<1x128xf32>
    %cst_17 = arith.constant 0.000000e+00 : f32
    %94 = vector.broadcast %cst_17 : f32 to vector<1x128xf32>
    %95 = arith.maximumf %86, %94 : vector<1x128xf32>
    %cst_18 = arith.constant 0.000000e+00 : f32
    %96 = vector.broadcast %cst_18 : f32 to vector<1x128xf32>
    %97 = arith.maximumf %93, %96 : vector<1x128xf32>
    %c16 = arith.constant 16 : index
    %98 = memref.load %arg1[%c16] : memref<40xf32, #tpu.memory_space<smem>>
    %c17 = arith.constant 17 : index
    %99 = memref.load %arg1[%c17] : memref<40xf32, #tpu.memory_space<smem>>
    %c18 = arith.constant 18 : index
    %100 = memref.load %arg1[%c18] : memref<40xf32, #tpu.memory_space<smem>>
    %c19 = arith.constant 19 : index
    %101 = memref.load %arg1[%c19] : memref<40xf32, #tpu.memory_space<smem>>
    %c8_19 = arith.constant 8 : index
    %102 = memref.load %arg2[%c8_19] : memref<20xf32, #tpu.memory_space<smem>>
    %c9_20 = arith.constant 9 : index
    %103 = memref.load %arg2[%c9_20] : memref<20xf32, #tpu.memory_space<smem>>
    %104 = vector.broadcast %98 : f32 to vector<1x128xf32>
    %105 = arith.mulf %95, %104 : vector<1x128xf32>
    %106 = vector.broadcast %99 : f32 to vector<1x128xf32>
    %107 = arith.mulf %97, %106 : vector<1x128xf32>
    %108 = arith.addf %105, %107 : vector<1x128xf32>
    %109 = vector.broadcast %102 : f32 to vector<1x128xf32>
    %110 = arith.addf %108, %109 : vector<1x128xf32>
    %111 = vector.broadcast %100 : f32 to vector<1x128xf32>
    %112 = arith.mulf %95, %111 : vector<1x128xf32>
    %113 = vector.broadcast %101 : f32 to vector<1x128xf32>
    %114 = arith.mulf %97, %113 : vector<1x128xf32>
    %115 = arith.addf %112, %114 : vector<1x128xf32>
    %116 = vector.broadcast %103 : f32 to vector<1x128xf32>
    %117 = arith.addf %115, %116 : vector<1x128xf32>
    %cst_21 = arith.constant 0.000000e+00 : f32
    %118 = vector.broadcast %cst_21 : f32 to vector<1x128xf32>
    %119 = arith.maximumf %110, %118 : vector<1x128xf32>
    %cst_22 = arith.constant 0.000000e+00 : f32
    %120 = vector.broadcast %cst_22 : f32 to vector<1x128xf32>
    %121 = arith.maximumf %117, %120 : vector<1x128xf32>
    %c20 = arith.constant 20 : index
    %122 = memref.load %arg1[%c20] : memref<40xf32, #tpu.memory_space<smem>>
    %c21 = arith.constant 21 : index
    %123 = memref.load %arg1[%c21] : memref<40xf32, #tpu.memory_space<smem>>
    %c22 = arith.constant 22 : index
    %124 = memref.load %arg1[%c22] : memref<40xf32, #tpu.memory_space<smem>>
    %c23 = arith.constant 23 : index
    %125 = memref.load %arg1[%c23] : memref<40xf32, #tpu.memory_space<smem>>
    %c10_23 = arith.constant 10 : index
    %126 = memref.load %arg2[%c10_23] : memref<20xf32, #tpu.memory_space<smem>>
    %c11_24 = arith.constant 11 : index
    %127 = memref.load %arg2[%c11_24] : memref<20xf32, #tpu.memory_space<smem>>
    %128 = vector.broadcast %122 : f32 to vector<1x128xf32>
    %129 = arith.mulf %119, %128 : vector<1x128xf32>
    %130 = vector.broadcast %123 : f32 to vector<1x128xf32>
    %131 = arith.mulf %121, %130 : vector<1x128xf32>
    %132 = arith.addf %129, %131 : vector<1x128xf32>
    %133 = vector.broadcast %126 : f32 to vector<1x128xf32>
    %134 = arith.addf %132, %133 : vector<1x128xf32>
    %135 = vector.broadcast %124 : f32 to vector<1x128xf32>
    %136 = arith.mulf %119, %135 : vector<1x128xf32>
    %137 = vector.broadcast %125 : f32 to vector<1x128xf32>
    %138 = arith.mulf %121, %137 : vector<1x128xf32>
    %139 = arith.addf %136, %138 : vector<1x128xf32>
    %140 = vector.broadcast %127 : f32 to vector<1x128xf32>
    %141 = arith.addf %139, %140 : vector<1x128xf32>
    %cst_25 = arith.constant 0.000000e+00 : f32
    %142 = vector.broadcast %cst_25 : f32 to vector<1x128xf32>
    %143 = arith.maximumf %134, %142 : vector<1x128xf32>
    %cst_26 = arith.constant 0.000000e+00 : f32
    %144 = vector.broadcast %cst_26 : f32 to vector<1x128xf32>
    %145 = arith.maximumf %141, %144 : vector<1x128xf32>
    %c24 = arith.constant 24 : index
    %146 = memref.load %arg1[%c24] : memref<40xf32, #tpu.memory_space<smem>>
    %c25 = arith.constant 25 : index
    %147 = memref.load %arg1[%c25] : memref<40xf32, #tpu.memory_space<smem>>
    %c26 = arith.constant 26 : index
    %148 = memref.load %arg1[%c26] : memref<40xf32, #tpu.memory_space<smem>>
    %c27 = arith.constant 27 : index
    %149 = memref.load %arg1[%c27] : memref<40xf32, #tpu.memory_space<smem>>
    %c12_27 = arith.constant 12 : index
    %150 = memref.load %arg2[%c12_27] : memref<20xf32, #tpu.memory_space<smem>>
    %c13_28 = arith.constant 13 : index
    %151 = memref.load %arg2[%c13_28] : memref<20xf32, #tpu.memory_space<smem>>
    %152 = vector.broadcast %146 : f32 to vector<1x128xf32>
    %153 = arith.mulf %143, %152 : vector<1x128xf32>
    %154 = vector.broadcast %147 : f32 to vector<1x128xf32>
    %155 = arith.mulf %145, %154 : vector<1x128xf32>
    %156 = arith.addf %153, %155 : vector<1x128xf32>
    %157 = vector.broadcast %150 : f32 to vector<1x128xf32>
    %158 = arith.addf %156, %157 : vector<1x128xf32>
    %159 = vector.broadcast %148 : f32 to vector<1x128xf32>
    %160 = arith.mulf %143, %159 : vector<1x128xf32>
    %161 = vector.broadcast %149 : f32 to vector<1x128xf32>
    %162 = arith.mulf %145, %161 : vector<1x128xf32>
    %163 = arith.addf %160, %162 : vector<1x128xf32>
    %164 = vector.broadcast %151 : f32 to vector<1x128xf32>
    %165 = arith.addf %163, %164 : vector<1x128xf32>
    %cst_29 = arith.constant 0.000000e+00 : f32
    %166 = vector.broadcast %cst_29 : f32 to vector<1x128xf32>
    %167 = arith.maximumf %158, %166 : vector<1x128xf32>
    %cst_30 = arith.constant 0.000000e+00 : f32
    %168 = vector.broadcast %cst_30 : f32 to vector<1x128xf32>
    %169 = arith.maximumf %165, %168 : vector<1x128xf32>
    %c28 = arith.constant 28 : index
    %170 = memref.load %arg1[%c28] : memref<40xf32, #tpu.memory_space<smem>>
    %c29 = arith.constant 29 : index
    %171 = memref.load %arg1[%c29] : memref<40xf32, #tpu.memory_space<smem>>
    %c30 = arith.constant 30 : index
    %172 = memref.load %arg1[%c30] : memref<40xf32, #tpu.memory_space<smem>>
    %c31 = arith.constant 31 : index
    %173 = memref.load %arg1[%c31] : memref<40xf32, #tpu.memory_space<smem>>
    %c14_31 = arith.constant 14 : index
    %174 = memref.load %arg2[%c14_31] : memref<20xf32, #tpu.memory_space<smem>>
    %c15_32 = arith.constant 15 : index
    %175 = memref.load %arg2[%c15_32] : memref<20xf32, #tpu.memory_space<smem>>
    %176 = vector.broadcast %170 : f32 to vector<1x128xf32>
    %177 = arith.mulf %167, %176 : vector<1x128xf32>
    %178 = vector.broadcast %171 : f32 to vector<1x128xf32>
    %179 = arith.mulf %169, %178 : vector<1x128xf32>
    %180 = arith.addf %177, %179 : vector<1x128xf32>
    %181 = vector.broadcast %174 : f32 to vector<1x128xf32>
    %182 = arith.addf %180, %181 : vector<1x128xf32>
    %183 = vector.broadcast %172 : f32 to vector<1x128xf32>
    %184 = arith.mulf %167, %183 : vector<1x128xf32>
    %185 = vector.broadcast %173 : f32 to vector<1x128xf32>
    %186 = arith.mulf %169, %185 : vector<1x128xf32>
    %187 = arith.addf %184, %186 : vector<1x128xf32>
    %188 = vector.broadcast %175 : f32 to vector<1x128xf32>
    %189 = arith.addf %187, %188 : vector<1x128xf32>
    %cst_33 = arith.constant 0.000000e+00 : f32
    %190 = vector.broadcast %cst_33 : f32 to vector<1x128xf32>
    %191 = arith.maximumf %182, %190 : vector<1x128xf32>
    %cst_34 = arith.constant 0.000000e+00 : f32
    %192 = vector.broadcast %cst_34 : f32 to vector<1x128xf32>
    %193 = arith.maximumf %189, %192 : vector<1x128xf32>
    %c32 = arith.constant 32 : index
    %194 = memref.load %arg1[%c32] : memref<40xf32, #tpu.memory_space<smem>>
    %c33 = arith.constant 33 : index
    %195 = memref.load %arg1[%c33] : memref<40xf32, #tpu.memory_space<smem>>
    %c34 = arith.constant 34 : index
    %196 = memref.load %arg1[%c34] : memref<40xf32, #tpu.memory_space<smem>>
    %c35 = arith.constant 35 : index
    %197 = memref.load %arg1[%c35] : memref<40xf32, #tpu.memory_space<smem>>
    %c16_35 = arith.constant 16 : index
    %198 = memref.load %arg2[%c16_35] : memref<20xf32, #tpu.memory_space<smem>>
    %c17_36 = arith.constant 17 : index
    %199 = memref.load %arg2[%c17_36] : memref<20xf32, #tpu.memory_space<smem>>
    %200 = vector.broadcast %194 : f32 to vector<1x128xf32>
    %201 = arith.mulf %191, %200 : vector<1x128xf32>
    %202 = vector.broadcast %195 : f32 to vector<1x128xf32>
    %203 = arith.mulf %193, %202 : vector<1x128xf32>
    %204 = arith.addf %201, %203 : vector<1x128xf32>
    %205 = vector.broadcast %198 : f32 to vector<1x128xf32>
    %206 = arith.addf %204, %205 : vector<1x128xf32>
    %207 = vector.broadcast %196 : f32 to vector<1x128xf32>
    %208 = arith.mulf %191, %207 : vector<1x128xf32>
    %209 = vector.broadcast %197 : f32 to vector<1x128xf32>
    %210 = arith.mulf %193, %209 : vector<1x128xf32>
    %211 = arith.addf %208, %210 : vector<1x128xf32>
    %212 = vector.broadcast %199 : f32 to vector<1x128xf32>
    %213 = arith.addf %211, %212 : vector<1x128xf32>
    %cst_37 = arith.constant 0.000000e+00 : f32
    %214 = vector.broadcast %cst_37 : f32 to vector<1x128xf32>
    %215 = arith.maximumf %206, %214 : vector<1x128xf32>
    %cst_38 = arith.constant 0.000000e+00 : f32
    %216 = vector.broadcast %cst_38 : f32 to vector<1x128xf32>
    %217 = arith.maximumf %213, %216 : vector<1x128xf32>
    %c36 = arith.constant 36 : index
    %218 = memref.load %arg1[%c36] : memref<40xf32, #tpu.memory_space<smem>>
    %c37 = arith.constant 37 : index
    %219 = memref.load %arg1[%c37] : memref<40xf32, #tpu.memory_space<smem>>
    %c38 = arith.constant 38 : index
    %220 = memref.load %arg1[%c38] : memref<40xf32, #tpu.memory_space<smem>>
    %c39 = arith.constant 39 : index
    %221 = memref.load %arg1[%c39] : memref<40xf32, #tpu.memory_space<smem>>
    %c18_39 = arith.constant 18 : index
    %222 = memref.load %arg2[%c18_39] : memref<20xf32, #tpu.memory_space<smem>>
    %c19_40 = arith.constant 19 : index
    %223 = memref.load %arg2[%c19_40] : memref<20xf32, #tpu.memory_space<smem>>
    %224 = vector.broadcast %218 : f32 to vector<1x128xf32>
    %225 = arith.mulf %215, %224 : vector<1x128xf32>
    %226 = vector.broadcast %219 : f32 to vector<1x128xf32>
    %227 = arith.mulf %217, %226 : vector<1x128xf32>
    %228 = arith.addf %225, %227 : vector<1x128xf32>
    %229 = vector.broadcast %222 : f32 to vector<1x128xf32>
    %230 = arith.addf %228, %229 : vector<1x128xf32>
    %231 = vector.broadcast %220 : f32 to vector<1x128xf32>
    %232 = arith.mulf %215, %231 : vector<1x128xf32>
    %233 = vector.broadcast %221 : f32 to vector<1x128xf32>
    %234 = arith.mulf %217, %233 : vector<1x128xf32>
    %235 = arith.addf %232, %234 : vector<1x128xf32>
    %236 = vector.broadcast %223 : f32 to vector<1x128xf32>
    %237 = arith.addf %235, %236 : vector<1x128xf32>
    %c0_41 = arith.constant 0 : index
    %c0_42 = arith.constant 0 : index
    %238 = vector.load %arg4[%c0_41, %c0_42] : memref<2x128xf32, #tpu.memory_space<vmem>>, vector<1x128xf32>
    tpu.vector_store %arg4[%c0_41, %c0_42], %230 {strides = array<i32>} : memref<2x128xf32, #tpu.memory_space<vmem>>, vector<1x128xf32>,
    %c1_43 = arith.constant 1 : index
    %c0_44 = arith.constant 0 : index
    %239 = vector.load %arg4[%c1_43, %c0_44] : memref<2x128xf32, #tpu.memory_space<vmem>>, vector<1x128xf32>
    tpu.vector_store %arg4[%c1_43, %c0_44], %237 {strides = array<i32>} : memref<2x128xf32, #tpu.memory_space<vmem>>, vector<1x128xf32>,
    return
  }
  func.func @transform_0(%arg0: i32) -> i32 {
    %c0_i32 = arith.constant 0 : i32
    %c0_i32_0 = arith.constant 0 : i32
    return %c0_i32 : i32
  }
  func.func @transform_1(%arg0: i32) -> i32 {
    %c0_i32 = arith.constant 0 : i32
    %c0_i32_0 = arith.constant 0 : i32
    return %c0_i32 : i32
  }
  func.func @transform_2(%arg0: i32) -> (i32, i32) {
    %c0_i32 = arith.constant 0 : i32
    %c0_i32_0 = arith.constant 0 : i32
    return %c0_i32, %arg0 : i32, i32
  }
  func.func @transform_3(%arg0: i32) -> (i32, i32) {
    %c0_i32 = arith.constant 0 : i32
    %c0_i32_0 = arith.constant 0 : i32
    return %c0_i32, %arg0 : i32, i32
  }
}

</mosaic_0001>

<bundles_post_ra>
// kernel: tpu_custom_call.1
= control target key start
LH: loop header
LB: loop body
LE: loop exit
PB: predicated region body
PF: predicated region fallthrough
CT: control target
= control target key end

     0   :  { %8 = vsyncpa [#allocation4], 0  ;;  %s481_s0 = inlined_call_operand.hbm [shape: f32[40], index: 0, kind: input, shape index: {}]   ;;  %s482_s1 = inlined_call_operand.vmem [shape: f32[20], index: 1, kind: input, shape index: {}]   ;;  %s483_s2 = inlined_call_operand.vmem [shape: f32[2,128], index: 2, kind: input, shape index: {}]   ;;  %s484_s3 = inlined_call_operand.hbm [shape: f32[2,128], index: 3, kind: output, shape index: {}]  }
   0x1   :  { %9 = vsyncpa [#allocation5], 0 }
   0x2   :  { %10 = vsyncpa [#allocation3], 0  ;;  %s25_s14 = sshll.u32 %s482_s1, 4  ;;  %s383_s15 = smov [#allocation2]   ;;  %s26_s14 = int_to_ptr.vmem [resolvable:$true] %s25_s14 }
   0x3   :  { %18 = dma.hbm_to_smem %s481_s0, 16, %s383_s15, [#allocation4]  }
   0x4   :  { %s345_s18 = scalar_lea.vmem %s26_s14, 16  ;;  %p350_p1 = scmp.lt.s32.totalorder %s26_s14, %s26_s14 }
   0x5   :  { %p346_p0 = scmp.ne.s32.totalorder %s26_s14, %s345_s18  ;;  %p351_p2 = scmp.lt.s32.totalorder %s345_s18, %s345_s18 }
   0x7   :  { %p352_p3 = por %p351_p2, %p350_p1 }
   0x9   :  { %p353_p4 = pnand %p352_p3, %p346_p0 }
   0xb   :  { %356 = shalt.err (!%p353_p4)
}
   0xc   :  { %s384_s19 = smov [#allocation6]  }
   0xd   :  { %28 = dma.vmem_to_smem %s26_s14, 16, %s384_s19, [#allocation5]  }
   0xe   :  { %377 = dma.done.wait [#allocation4], 16  }
   0xf   :  { %378 = vsyncadd [#allocation4], 4294967280 }
  0x10   :  { %379 = dma.done.wait [#allocation5], 16  }
  0x11   :  { %380 = vsyncadd [#allocation5], 4294967280 }
  0x12   :  { %37 = sfence }
  0x13   :  { %s40_s1 = sld [smem:[#allocation2]]  ;;  %v38_v0 = vld [vmem:[%s483_s2] sm:$0x1]  ;;  %v39_v1 = vld [vmem:[%s483_s2 + $0x1] sm:$0x1] }
  0x14   :  { %s276_s20 = sld [smem:[#allocation2 + $0x1]] }
  0x15   :  { %s277_s21 = sld [smem:[#allocation2 + $0x2]] }
  0x16   :  { %s278_s22 = sld [smem:[#allocation2 + $0x3]] }
  0x17   :  { %s44_s24 = sld [smem:[#allocation6]] }
  0x18   :  { %s279_s27 = sld [smem:[#allocation6 + $0x1]] }
  0x19   :  { %v46_v2 = vstv %s40_s1  ;;  %s280_s28 = sld [smem:[#allocation2 + $0x4]] }
  0x1a   :  { %v47_v3 = vmul.f32 %v46_v2, %v38_v0  ;;  %v48_v4 = vstv %s276_s20  ;;  %s281_s29 = sld [smem:[#allocation2 + $0x5]] }
  0x1b   :  { %v49_v5 = vmul.f32 %v48_v4, %v39_v1  ;;  %v53_v6 = vstv %s277_s21  ;;  %s282_s30 = sld [smem:[#allocation2 + $0x6]] }
  0x1c   :  { %v54_v7 = vmul.f32 %v53_v6, %v38_v0  ;;  %v55_v8 = vstv %s278_s22  ;;  %s283_s4 = sld [smem:[#allocation2 + $0x7]] }
  0x1d   :  { %v50_v9 = vadd.f32 %v49_v5, %v47_v3  ;;  %v51_v10 = vstv %s44_s24  ;;  %v56_v11 = vmul.f32 %v55_v8, %v39_v1  ;;  %s284_s5 = sld [smem:[#allocation6 + $0x2]] }
  0x1e   :  { %v58_v12 = vstv %s279_s27  ;;  %s285_s6 = sld [smem:[#allocation6 + $0x3]] }
  0x1f   :  { %v52_v13 = vadd.f32 %v51_v10, %v50_v9  ;;  %v57_v14 = vadd.f32 %v56_v11, %v54_v7  ;;  %s418_s2 = sld [smem:[#allocation2 + $0x8]]  ;;  %v68_v15 = vstv %s280_s28 }
  0x20   :  { %s420_s7 = sld [smem:[#allocation2 + $0x9]]  ;;  %v70_v19 = vstv %s281_s29 }
  0x21   :  { %v59_v16 = vadd.f32 %v58_v12, %v57_v14  ;;  %v60_v17 = vmax.f32 %v52_v13, 0.0  ;;  %v75_v18 = vstv %s282_s30  ;;  %s288_s8 = sld [smem:[#allocation2 + $0xa]] }
  0x22   :  { %v77_v20 = vstv %s283_s4  ;;  %s289_s9 = sld [smem:[#allocation2 + $0xb]] }
  0x23   :  { %v61_v21 = vmax.f32 %v59_v16, 0.0  ;;  %v69_v22 = vmul.f32 %v68_v15, %v60_v17  ;;  %v76_v23 = vmul.f32 %v75_v18, %v60_v17  ;;  %s290_s10 = sld [smem:[#allocation6 + $0x4]]  ;;  %v73_v26 = vstv %s284_s5 }
  0x24   :  { %v80_v27 = vstv %s285_s6  ;;  %s291_s11 = sld [smem:[#allocation6 + $0x5]] }
  0x25   :  { %v71_v24 = vmul.f32 %v70_v19, %v61_v21  ;;  %v78_v25 = vmul.f32 %v77_v20, %v61_v21  ;;  %s422_s12 = sld [smem:[#allocation2 + $0xc]]  ;;  %v90_v32 = vstv %s418_s2 }
  0x26   :  { %s424_s13 = sld [smem:[#allocation2 + $0xd]]  ;;  %v92_v33 = vstv %s420_s7 }
  0x27   :  { %v72_v28 = vadd.f32 %v71_v24, %v69_v22  ;;  %v79_v29 = vadd.f32 %v78_v25, %v76_v23  ;;  %s426_s14 = sld [smem:[#allocation2 + $0xe]]  ;;  %v97_v34 = vstv %s288_s8 }
  0x28   :  { %v99_v35 = vstv %s289_s9  ;;  %s295_s15 = sld [smem:[#allocation2 + $0xf]] }
  0x29   :  { %v74_v30 = vadd.f32 %v73_v26, %v72_v28  ;;  %v81_v31 = vadd.f32 %v80_v27, %v79_v29  ;;  %s296_s16 = sld [smem:[#allocation6 + $0x6]]  ;;  %v95_v42 = vstv %s290_s10 }
  0x2a   :  { %v102_v43 = vstv %s291_s11  ;;  %s297_s17 = sld [smem:[#allocation6 + $0x7]] }
  0x2b   :  { %v82_v36 = vmax.f32 %v74_v30, 0.0  ;;  %v83_v37 = vmax.f32 %v81_v31, 0.0  ;;  %s430_s18 = sld [smem:[#allocation2 + $0x10]]  ;;  %v112_v48 = vstv %s422_s12 }
  0x2c   :  { %s432_s19 = sld [smem:[#allocation2 + $0x11]]  ;;  %v114_v49 = vstv %s424_s13 }
  0x2d   :  { %v91_v38 = vmul.f32 %v90_v32, %v82_v36  ;;  %v93_v39 = vmul.f32 %v92_v33, %v83_v37  ;;  %v98_v40 = vmul.f32 %v97_v34, %v82_v36  ;;  %v100_v41 = vmul.f32 %v99_v35, %v83_v37  ;;  %s434_s1 = sld [smem:[#allocation2 + $0x12]] }
  0x2e   :  { %v119_v50 = vstv %s426_s14  ;;  %v121_v51 = vstv %s295_s15  ;;  %s301_s20 = sld [smem:[#allocation2 + $0x13]] }
  0x2f   :  { %v94_v44 = vadd.f32 %v93_v39, %v91_v38  ;;  %v101_v45 = vadd.f32 %v100_v41, %v98_v40  ;;  %s302_s21 = sld [smem:[#allocation6 + $0x8]]  ;;  %v117_v58 = vstv %s296_s16 }
  0x30   :  { %v124_v59 = vstv %s297_s17  ;;  %s303_s22 = sld [smem:[#allocation6 + $0x9]] }
  0x31   :  { %v96_v46 = vadd.f32 %v95_v42, %v94_v44  ;;  %v103_v47 = vadd.f32 %v102_v43, %v101_v45  ;;  %s439_s0 = sld [smem:[#allocation2 + $0x14]]  ;;  %v134_v0 = vstv %s430_s18 }
  0x32   :  { %s441_s23 = sld [smem:[#allocation2 + $0x15]]  ;;  %v136_v1 = vstv %s432_s19 }
  0x33   :  { %v104_v52 = vmax.f32 %v96_v46, 0.0  ;;  %v105_v53 = vmax.f32 %v103_v47, 0.0  ;;  %s443_s24 = sld [smem:[#allocation2 + $0x16]]  ;;  %v141_v2 = vstv %s434_s1 }
  0x34   :  { %v143_v3 = vstv %s301_s20  ;;  %s307_s25 = sld [smem:[#allocation2 + $0x17]] }
  0x35   :  { %v113_v54 = vmul.f32 %v112_v48, %v104_v52  ;;  %v115_v55 = vmul.f32 %v114_v49, %v105_v53  ;;  %v120_v56 = vmul.f32 %v119_v50, %v104_v52  ;;  %v122_v57 = vmul.f32 %v121_v51, %v105_v53  ;;  %s308_s26 = sld [smem:[#allocation6 + $0xa]] }
  0x36   :  { %v139_v10 = vstv %s302_s21  ;;  %v146_v11 = vstv %s303_s22  ;;  %s309_s27 = sld [smem:[#allocation6 + $0xb]] }
  0x37   :  { %v116_v60 = vadd.f32 %v115_v55, %v113_v54  ;;  %v123_v61 = vadd.f32 %v122_v57, %v120_v56  ;;  %s448_s28 = sld [smem:[#allocation2 + $0x18]]  ;;  %v156_v16 = vstv %s439_s0  ;;  %s385_s0 = smov [#allocation7]  }
  0x38   :  { %s450_s29 = sld [smem:[#allocation2 + $0x19]]  ;;  %v158_v17 = vstv %s441_s23  ;;  %s266_s23 = sshll.u32 %s385_s0, 4  ;;  %s267_s23 = int_to_ptr.vmem [resolvable:$true] %s266_s23 }
  0x39   :  { %v118_v62 = vadd.f32 %v117_v58, %v116_v60  ;;  %v125_v63 = vadd.f32 %v124_v59, %v123_v61  ;;  %s452_s30 = sld [smem:[#allocation2 + $0x1a]]  ;;  %v163_v18 = vstv %s443_s24  ;;  %s357_s24 = scalar_lea.vmem %s267_s23, 32 }
  0x3a   :  { %v165_v19 = vstv %s307_s25  ;;  %s313_s4 = sld [smem:[#allocation2 + $0x1b]]  ;;  %p358_p5 = scmp.ne.s32.totalorder %s267_s23, %s357_s24 }
  0x3b   :  { %v126_v4 = vmax.f32 %v118_v62, 0.0  ;;  %v127_v5 = vmax.f32 %v125_v63, 0.0  ;;  %s314_s5 = sld [smem:[#allocation6 + $0xc]]  ;;  %v161_v26 = vstv %s308_s26  ;;  %p362_p6 = scmp.lt.s32.totalorder %s267_s23, %s267_s23 }
  0x3c   :  { %v168_v27 = vstv %s309_s27  ;;  %s315_s6 = sld [smem:[#allocation6 + $0xd]]  ;;  %p363_p7 = scmp.lt.s32.totalorder %s357_s24, %s357_s24 }
  0x3d   :  { %v135_v6 = vmul.f32 %v134_v0, %v126_v4  ;;  %v137_v7 = vmul.f32 %v136_v1, %v127_v5  ;;  %v142_v8 = vmul.f32 %v141_v2, %v126_v4  ;;  %v144_v9 = vmul.f32 %v143_v3, %v127_v5  ;;  %s457_s2 = sld [smem:[#allocation2 + $0x1c]] }
  0x3e   :  { %s459_s7 = sld [smem:[#allocation2 + $0x1d]]  ;;  %v178_v32 = vstv %s448_s28  ;;  %v180_v33 = vstv %s450_s29  ;;  %p364_p8 = por %p363_p7, %p362_p6 }
  0x3f   :  { %v138_v12 = vadd.f32 %v137_v7, %v135_v6  ;;  %v145_v13 = vadd.f32 %v144_v9, %v142_v8  ;;  %s461_s8 = sld [smem:[#allocation2 + $0x1e]]  ;;  %v185_v34 = vstv %s452_s30 }
  0x40   :  { %v187_v35 = vstv %s313_s4  ;;  %s319_s9 = sld [smem:[#allocation2 + $0x1f]]  ;;  %p365_p9 = pnand %p364_p8, %p358_p5 }
  0x41   :  { %v140_v14 = vadd.f32 %v139_v10, %v138_v12  ;;  %v147_v15 = vadd.f32 %v146_v11, %v145_v13  ;;  %s320_s10 = sld [smem:[#allocation6 + $0xe]]  ;;  %v183_v42 = vstv %s314_s5 }
  0x42   :  { %v190_v43 = vstv %s315_s6  ;;  %s321_s11 = sld [smem:[#allocation6 + $0xf]] }
  0x43   :  { %v148_v20 = vmax.f32 %v140_v14, 0.0  ;;  %v149_v21 = vmax.f32 %v147_v15, 0.0  ;;  %s466_s12 = sld [smem:[#allocation2 + $0x20]]  ;;  %v200_v48 = vstv %s457_s2 }
  0x44   :  { %s468_s13 = sld [smem:[#allocation2 + $0x21]]  ;;  %v202_v49 = vstv %s459_s7 }
  0x45   :  { %v157_v22 = vmul.f32 %v156_v16, %v148_v20  ;;  %v159_v23 = vmul.f32 %v158_v17, %v149_v21  ;;  %v164_v24 = vmul.f32 %v163_v18, %v148_v20  ;;  %v166_v25 = vmul.f32 %v165_v19, %v149_v21  ;;  %s470_s14 = sld [smem:[#allocation2 + $0x22]] }
  0x46   :  { %v207_v50 = vstv %s461_s8  ;;  %v209_v51 = vstv %s319_s9  ;;  %s325_s15 = sld [smem:[#allocation2 + $0x23]] }
  0x47   :  { %v160_v28 = vadd.f32 %v159_v23, %v157_v22  ;;  %v167_v29 = vadd.f32 %v166_v25, %v164_v24  ;;  %s326_s16 = sld [smem:[#allocation6 + $0x10]]  ;;  %v205_v58 = vstv %s320_s10 }
  0x48   :  { %v212_v59 = vstv %s321_s11  ;;  %s327_s17 = sld [smem:[#allocation6 + $0x11]] }
  0x49   :  { %v162_v30 = vadd.f32 %v161_v26, %v160_v28  ;;  %v169_v31 = vadd.f32 %v168_v27, %v167_v29  ;;  %s328_s18 = sld [smem:[#allocation2 + $0x24]]  ;;  %v222_v0 = vstv %s466_s12 }
  0x4a   :  { %s329_s19 = sld [smem:[#allocation2 + $0x25]]  ;;  %v224_v1 = vstv %s468_s13 }
  0x4b   :  { %v170_v36 = vmax.f32 %v162_v30, 0.0  ;;  %v171_v37 = vmax.f32 %v169_v31, 0.0  ;;  %s330_s1 = sld [smem:[#allocation2 + $0x26]]  ;;  %v229_v2 = vstv %s470_s14 }
  0x4c   :  { %v231_v3 = vstv %s325_s15  ;;  %s331_s20 = sld [smem:[#allocation2 + $0x27]] }
  0x4d   :  { %v179_v38 = vmul.f32 %v178_v32, %v170_v36  ;;  %v181_v39 = vmul.f32 %v180_v33, %v171_v37  ;;  %v186_v40 = vmul.f32 %v185_v34, %v170_v36  ;;  %v188_v41 = vmul.f32 %v187_v35, %v171_v37  ;;  %s332_s21 = sld [smem:[#allocation6 + $0x12]] }
  0x4e   :  { %v227_v10 = vstv %s326_s16  ;;  %v234_v11 = vstv %s327_s17  ;;  %s333_s22 = sld [smem:[#allocation6 + $0x13]] }
  0x4f   :  { %v182_v44 = vadd.f32 %v181_v39, %v179_v38  ;;  %v189_v45 = vadd.f32 %v188_v41, %v186_v40  ;;  %v244_v16 = vstv %s328_s18 }
  0x50   :  { %v246_v17 = vstv %s329_s19 }
  0x51   :  { %v184_v46 = vadd.f32 %v183_v42, %v182_v44  ;;  %v191_v47 = vadd.f32 %v190_v43, %v189_v45  ;;  %v251_v18 = vstv %s330_s1 }
  0x52   :  { %v253_v19 = vstv %s331_s20 }
  0x53   :  { %v192_v52 = vmax.f32 %v184_v46, 0.0  ;;  %v193_v53 = vmax.f32 %v191_v47, 0.0  ;;  %v249_v26 = vstv %s332_s21 }
  0x54   :  { %v256_v27 = vstv %s333_s22 }
  0x55   :  { %v201_v54 = vmul.f32 %v200_v48, %v192_v52  ;;  %v203_v55 = vmul.f32 %v202_v49, %v193_v53  ;;  %v208_v56 = vmul.f32 %v207_v50, %v192_v52  ;;  %v210_v57 = vmul.f32 %v209_v51, %v193_v53 }
  0x57   :  { %v204_v60 = vadd.f32 %v203_v55, %v201_v54  ;;  %v211_v61 = vadd.f32 %v210_v57, %v208_v56 }
  0x59   :  { %v206_v62 = vadd.f32 %v205_v58, %v204_v60  ;;  %v213_v63 = vadd.f32 %v212_v59, %v211_v61 }
  0x5b   :  { %v214_v4 = vmax.f32 %v206_v62, 0.0  ;;  %v215_v5 = vmax.f32 %v213_v63, 0.0 }
  0x5d   :  { %v223_v6 = vmul.f32 %v222_v0, %v214_v4  ;;  %v225_v7 = vmul.f32 %v224_v1, %v215_v5  ;;  %v230_v8 = vmul.f32 %v229_v2, %v214_v4  ;;  %v232_v9 = vmul.f32 %v231_v3, %v215_v5 }
  0x5f   :  { %v226_v12 = vadd.f32 %v225_v7, %v223_v6  ;;  %v233_v13 = vadd.f32 %v232_v9, %v230_v8 }
  0x61   :  { %v228_v14 = vadd.f32 %v227_v10, %v226_v12  ;;  %v235_v15 = vadd.f32 %v234_v11, %v233_v13 }
  0x63   :  { %v236_v20 = vmax.f32 %v228_v14, 0.0  ;;  %v237_v21 = vmax.f32 %v235_v15, 0.0 }
  0x65   :  { %v245_v22 = vmul.f32 %v244_v16, %v236_v20  ;;  %v247_v23 = vmul.f32 %v246_v17, %v237_v21  ;;  %v252_v24 = vmul.f32 %v251_v18, %v236_v20  ;;  %v254_v25 = vmul.f32 %v253_v19, %v237_v21 }
  0x67   :  { %v248_v28 = vadd.f32 %v247_v23, %v245_v22  ;;  %v255_v29 = vadd.f32 %v254_v25, %v252_v24 }
  0x69   :  { %v250_v30 = vadd.f32 %v249_v26, %v248_v28  ;;  %v257_v31 = vadd.f32 %v256_v27, %v255_v29 }
  0x6b   :  { %258 = vst [vmem:[#allocation7] sm:$0x1] %v250_v30  ;;  %259 = vst [vmem:[#allocation7 + $0x1] sm:$0x1] %v257_v31 }
  0x6c   :  { %368 = shalt.err (!%p365_p9)
}
  0x6d   :  { %269 = dma.vmem_to_hbm [thread:$0]  %s267_s23, 32, %s484_s3, [#allocation3]  }
  0x6e   :  { %381 = dma.done.wait [#allocation3], 32  }
  0x6f   :  { %382 = vsyncadd [#allocation3], 4294967264 }
  0x70   :  { %273 = vsyncpa [#allocation3], 1 }
  0x71   :  { %274 = vsyncpa [#allocation4], 1 }
  0x72   :  { %275 = vsyncpa [#allocation5], 1 }

</bundles_post_ra>
